<compile_context>
chip_gen: v6e
topology: v6e:2x2x1
jax: 0.10.0
libtpu: 0.0.40
codegen_flags: <defaults>
</compile_context>

<pallas_src>
import functools

import jax
import jax.numpy as jnp
from jax.experimental import pallas as pl
from jax.experimental.pallas import tpu as pltpu


def _tpu_budget():
    """Per-generation (vmem_limit_bytes, max batch-tile rows)."""
    try:
        kind = jax.devices()[0].device_kind.lower()
    except Exception:
        kind = ""
    if "v5 lite" in kind or "v5e" in kind or "v5lite" in kind:
        # 128 MiB physical VMEM but only 16 MiB default scoped -> raise the limit.
        return 64 << 20, 8192
    if "v6" in kind:
        # 128 MiB physical, 32 MiB default scoped.
        return 64 << 20, 8192
    if "7x" in kind or "v7" in kind or "tpu7" in kind:
        # v7x: 64 MiB physical / 32 MiB scoped -> smaller tile, explicit limit.
        return 32 << 20, 4096
    # Unknown chip: stay inside the default scoped VMEM.
    return None, 2048


_VMEM_LIMIT_BYTES, _DEFAULT_TILE_ROWS = _tpu_budget()


def _ctr_loss_kernel(bg_ref, tgt_ref, logits_ref, parts_ref, flags_ref,
                     acc_ref, flag_ref, *,
                     thinking_idx, batch, tile_b, tiles_per_split, total_tiles):
    """One (split, batch-tile) step of the fused loss.

    bg_ref:     SMEM (1,)            f32   beta * gamma (pre-update value)
    tgt_ref:    VMEM (tile_b, 1)     i8/i32 class targets for this tile
    logits_ref: VMEM (tile_b, C)            logits (native dtype) for this tile
    parts_ref:  VMEM (8, 128)        f32   this split's partial loss (broadcast)
    flags_ref:  VMEM (8, 128)        i32   this split's thinking flag (broadcast)
    acc_ref:    SMEM (1,)            f32   running partial-loss accumulator
    flag_ref:   SMEM (1,)            i32   running thinking flag
    """
    s = pl.program_id(0)          # parallel split (maps to a TensorCore on v7x)
    t = pl.program_id(1)          # arbitrary (reduction) tile index within the split
    n_t = pl.num_programs(1)

    x = logits_ref[...].astype(jnp.float32)                     # [tile_b, C]
    tb, c = x.shape

    # Row-wise log-sum-exp (exp/log on the EUP, reductions on the XLU).
    m = jnp.max(x, axis=-1, keepdims=True)
    lse = jnp.log(jnp.sum(jnp.exp(x - m), axis=-1, keepdims=True)) + m    # [tb, 1]

    # Gather x[row, target[row]] with a compare/select (C is tiny; no MXU).
    tgt = tgt_ref[...].astype(jnp.int32)                                   # [tb, 1]
    col = jax.lax.broadcasted_iota(jnp.int32, (tb, c), 1)
    x_tgt = jnp.sum(jnp.where(col == tgt, x, 0.0), axis=-1, keepdims=True)
    # Thinking class is a static column -> plain slice, no mask / extra reduce.
    x_think = x[:, thinking_idx:thinking_idx + 1]                          # [tb, 1]

    bg = bg_ref[0]
    # Per-row: CE(y) + bg*CE(think) == (1+bg)*lse - x[target] - bg*x[think].
    per_row = (1.0 + bg) * lse - x_tgt - bg * x_think                      # [tb, 1]

    # Mask rows past the real batch (ragged last tile and clamped phantom tiles).
    # Pad rows may hold garbage; TPU select does not propagate NaN/Inf from the
    # unselected operand, so masking after the math is safe.
    global_tile = s * tiles_per_split + t          # UNclamped logical tile index
    row = jax.lax.broadcasted_iota(jnp.int32, (tb, 1), 0)
    valid = (global_tile * tile_b + row) < batch
    per_row = jnp.where(valid, per_row, 0.0)

    partial = jnp.sum(per_row)

    @pl.when(t == 0)
    def _():
        acc_ref[0] = 0.0
        flag_ref[0] = 0

    acc_ref[0] += partial

    # The global last batch row lives at a statically known (split, tile, local row).
    flag_split = (total_tiles - 1) // tiles_per_split
    flag_tile = (total_tiles - 1) % tiles_per_split
    last_local = (batch - 1) % tile_b

    @pl.when((s == flag_split) & (t == flag_tile))
    def _():
        # thinking_idx is the last class, so "argmax == thinking_idx" under
        # first-occurrence argmax semantics is exactly "last logit strictly greater
        # than every other logit".
        x_last = logits_ref[pl.ds(last_local, 1), :].astype(jnp.float32)   # [1, C]
        think_val = jnp.sum(x_last[:, thinking_idx:thinking_idx + 1])
        col1 = jax.lax.broadcasted_iota(jnp.int32, (1, c), 1)
        others_max = jnp.max(jnp.where(col1 == thinking_idx, -jnp.inf, x_last))
        flag_ref[0] = (think_val > others_max).astype(jnp.int32)

    @pl.when(t == n_t - 1)
    def _():
        # Each split owns its own (8, 128) output block -> no cross-core races.
        parts_ref[...] = jnp.full(parts_ref.shape, acc_ref[0], dtype=jnp.float32)
        flags_ref[...] = jnp.full(flags_ref.shape, flag_ref[0], dtype=jnp.int32)


@functools.partial(
    jax.jit,
    static_argnames=("beta", "epsilon", "original_gamma", "thinking_idx",
                     "max_tile_rows"),
)
def _ctr_loss_step(y_hat, y, gamma, count, *, beta, epsilon, original_gamma,
                   thinking_idx, max_tile_rows=None):
    """Fused loss + device-side ThinkingReward state update (no host sync)."""
    b, c = y_hat.shape
    cap = _DEFAULT_TILE_ROWS if max_tile_rows is None else max_tile_rows
    # Capped tiles are kept multiples of 32 (int8 sublane packing); a full-batch
    # tile is always legal because it equals the array extent.
    tile_b = b if b <= cap else max(32, (cap // 32) * 32)
    total_tiles = pl.cdiv(b, tile_b)
    n_splits = 2 if total_tiles >= 2 else 1            # v7x: one split per TensorCore
    tiles_per_split = pl.cdiv(total_tiles, n_splits)
    grid = (n_splits, tiles_per_split)

    bg = (beta * gamma).astype(jnp.float32).reshape(1)  # pre-update gamma (matches torch)
    # int8 targets: 4x less VMEM per lane-padded (tile_b, 1) block, same HBM bytes.
    tgt_dtype = jnp.int8 if thinking_idx < 128 else jnp.int32
    tgt = y.astype(tgt_dtype).reshape(b, 1)

    def data_map(s, t):
        # Clamp phantom trailing tiles (when total_tiles % n_splits != 0) to the last
        # real block; the kernel masks their rows out via the UNclamped index.
        return (jnp.minimum(s * tiles_per_split + t, total_tiles - 1), 0)

    parts, flags = pl.pallas_call(
        functools.partial(_ctr_loss_kernel, thinking_idx=thinking_idx, batch=b,
                          tile_b=tile_b, tiles_per_split=tiles_per_split,
                          total_tiles=total_tiles),
        out_shape=(
            jax.ShapeDtypeStruct((n_splits * 8, 128), jnp.float32),
            jax.ShapeDtypeStruct((n_splits * 8, 128), jnp.int32),
        ),
        grid=grid,
        in_specs=[
            pl.BlockSpec(memory_space=pltpu.MemorySpace.SMEM),   # beta*gamma scalar
            pl.BlockSpec((tile_b, 1), data_map),                 # targets (int8)
            pl.BlockSpec((tile_b, c), data_map),                 # logits, native dtype
        ],
        out_specs=(
            pl.BlockSpec((8, 128), lambda s, t: (s, 0)),         # per-split partial loss
            pl.BlockSpec((8, 128), lambda s, t: (s, 0)),         # per-split thinking flag
        ),
        scratch_shapes=[pltpu.SMEM((1,), jnp.float32),
                        pltpu.SMEM((1,), jnp.int32)],
        compiler_params=pltpu.CompilerParams(
            dimension_semantics=("parallel", "arbitrary"),       # split || , tiles = reduction
            vmem_limit_bytes=_VMEM_LIMIT_BYTES),
    )(bg, tgt, y_hat)

    loss = jnp.sum(parts[::8, 0]) * (1.0 / b)
    thinking = jnp.max(flags[::8, 0]) > 0
    new_gamma = jnp.where(
        thinking,
        jnp.maximum(gamma - jnp.float32(epsilon), jnp.float32(0.0)),
        jnp.float32(original_gamma),
    ).astype(jnp.float32)
    new_count = jnp.where(thinking, count + 1, 0).astype(jnp.int32)
    return loss, new_gamma, new_count


class ClassificationThinkingRewardLoss:
    """JAX/Pallas port of the PyTorch module (forward + ThinkingReward state).

    gamma/count live as device scalars and are updated inside the jitted step,
    so __call__ never blocks on a device->host readback.
    """

    def __init__(self, gamma: float, beta: float, epsilon: float, num_classes: int):
        self.original_gamma = float(gamma)
        self.beta = float(beta)
        self.epsilon = float(epsilon)
        self.thinking_class_index = int(num_classes)  # logits have num_classes+1 columns
        self.gamma = jnp.asarray(gamma, dtype=jnp.float32)   # device-resident state
        self.count = jnp.asarray(0, dtype=jnp.int32)
        self.penalty = 1

    def __call__(self, y_hat, y):
        loss, self.gamma, self.count = _ctr_loss_step(
            y_hat, y, self.gamma, self.count,
            beta=self.beta, epsilon=self.epsilon,
            original_gamma=self.original_gamma,
            thinking_idx=self.thinking_class_index)
        return loss


def _reference(y_hat, y, beta, gamma, thinking_idx):
    logp = jax.nn.log_softmax(y_hat.astype(jnp.float32), axis=-1)
    ce_main = -jnp.mean(logp[jnp.arange(y_hat.shape[0]), y])
    ce_think = -jnp.mean(logp[:, thinking_idx])
    return ce_main + beta * gamma * ce_think


if __name__ == "__main__":
    key = jax.random.PRNGKey(0)
    k1, k2, k3, k4 = jax.random.split(key, 4)

    num_classes = 9          # thinking class index == 9 -> logits have 10 columns
    B, C = 8, num_classes + 1
    gamma, beta, epsilon = 0.5, 0.1, 0.05

    y_hat = jax.random.normal(k1, (B, C), dtype=jnp.float32)
    y = jax.random.randint(k2, (B,), 0, num_classes, dtype=jnp.int32)

    module = ClassificationThinkingRewardLoss(gamma, beta, epsilon, num_classes)
    out = jax.block_until_ready(module(y_hat, y))

    ref = _reference(y_hat, y, beta, gamma, num_classes)
    assert jnp.allclose(out, ref, rtol=1e-5, atol=1e-5), (out, ref)

    # Stateful gamma update mirrors ThinkingReward.forward (pre-update gamma in loss).
    thinking_hit = bool(jnp.argmax(y_hat[-1]) == num_classes)
    expect_gamma = max(gamma - epsilon, 0.0) if thinking_hit else gamma
    assert jnp.allclose(module.gamma, expect_gamma, atol=1e-7), (module.gamma, expect_gamma)

    # Second call exercises the device-side gamma/count carry (no host round trip).
    out2 = jax.block_until_ready(module(y_hat, y))
    ref2 = _reference(y_hat, y, beta, float(expect_gamma), num_classes)
    assert jnp.allclose(out2, ref2, rtol=1e-5, atol=1e-5), (out2, ref2)

    # bf16 logits go straight into the kernel (f32 cast happens in-kernel).
    y_hat_bf16 = y_hat.astype(jnp.bfloat16)
    module_bf16 = ClassificationThinkingRewardLoss(gamma, beta, epsilon, num_classes)
    out_bf16 = jax.block_until_ready(module_bf16(y_hat_bf16, y))
    ref_bf16 = _reference(y_hat_bf16.astype(jnp.float32), y, beta, gamma, num_classes)
    assert jnp.allclose(out_bf16, ref_bf16, rtol=1e-5, atol=1e-5), (out_bf16, ref_bf16)

    # Exercise the multi-tile / 2-way-split / ragged-edge / thinking-hit paths with a
    # deliberately tiny tile override so the data stays small (300 x 10 f32).
    B3 = 300
    y_hat3 = jax.random.normal(k3, (B3, C), dtype=jnp.float32)
    y_hat3 = y_hat3.at[-1, num_classes].set(50.0)   # force argmax(last row) == thinking
    y3 = jax.random.randint(k4, (B3,), 0, num_classes, dtype=jnp.int32)
    loss3, gamma3, count3 = _ctr_loss_step(
        y_hat3, y3, jnp.asarray(gamma, jnp.float32), jnp.asarray(0, jnp.int32),
        beta=beta, epsilon=epsilon, original_gamma=gamma,
        thinking_idx=num_classes, max_tile_rows=128)
    jax.block_until_ready(loss3)
    ref3 = _reference(y_hat3, y3, beta, gamma, num_classes)
    assert jnp.allclose(loss3, ref3, rtol=1e-4, atol=1e-4), (loss3, ref3)
    assert jnp.allclose(gamma3, max(gamma - epsilon, 0.0), atol=1e-7), gamma3
    assert int(count3) == 1, count3

    print("KERNEL_OK")
</pallas_src>

<mosaic_0001>
module attributes {stable_mosaic.version = 11 : i64} {
  func.func @_ctr_loss_kernel(%arg0: i32, %arg1: i32, %arg2: memref<1xf32, #tpu.memory_space<smem>>, %arg3: memref<8x1xi8, #tpu.memory_space<vmem>>, %arg4: memref<8x10xf32, #tpu.memory_space<vmem>>, %arg5: memref<8x128xf32, #tpu.memory_space<vmem>>, %arg6: memref<8x128xi32, #tpu.memory_space<vmem>>, %arg7: memref<1xf32, #tpu.memory_space<smem>>, %arg8: memref<1xi32, #tpu.memory_space<smem>>) attributes {dimension_semantics = [#tpu.dimension_semantics<parallel>, #tpu.dimension_semantics<arbitrary>], iteration_bounds = array<i64: 1, 1>, scalar_prefetch = 0 : i64, scratch_operands = 2 : i64, tpu.core_type = #tpu.core_type<tc>, window_params = [{transform_indices = @transform_0, window_bounds = array<i64: 1>}, {transform_indices = @transform_1, window_bounds = array<i64: 8, 1>}, {transform_indices = @transform_2, window_bounds = array<i64: 8, 10>}, {transform_indices = @transform_3, window_bounds = array<i64: 8, 128>}, {transform_indices = @transform_4, window_bounds = array<i64: 8, 128>}]} {
    %c0 = arith.constant 0 : index
    %c0_0 = arith.constant 0 : index
    %0 = vector.load %arg4[%c0, %c0_0] : memref<8x10xf32, #tpu.memory_space<vmem>>, vector<8x10xf32>
    %cst = arith.constant dense<0xFF800000> : vector<8xf32>
    %1 = vector.multi_reduction <maximumf>, %0, %cst [1] : vector<8x10xf32> to vector<8xf32>
    %2 = vector.shape_cast %1 : vector<8xf32> to vector<8x1xf32>
    %3 = vector.broadcast %2 : vector<8x1xf32> to vector<8x10xf32>
    %4 = arith.subf %0, %3 : vector<8x10xf32>
    %5 = math.exp %4 : vector<8x10xf32>
    %cst_1 = arith.constant dense<0.000000e+00> : vector<8xf32>
    %6 = vector.multi_reduction <add>, %5, %cst_1 [1] : vector<8x10xf32> to vector<8xf32>
    %7 = vector.shape_cast %6 : vector<8xf32> to vector<8x1xf32>
    %8 = math.log %7 : vector<8x1xf32>
    %9 = arith.addf %8, %2 : vector<8x1xf32>
    %c0_2 = arith.constant 0 : index
    %c0_3 = arith.constant 0 : index
    %10 = vector.load %arg3[%c0_2, %c0_3] : memref<8x1xi8, #tpu.memory_space<vmem>>, vector<8x1xi8>
    %11 = arith.extsi %10 : vector<8x1xi8> to vector<8x1xi32>
    %12 = tpu.iota {dimensions = array<i32: 1>} : vector<8x10xi32>
    %13 = vector.broadcast %11 : vector<8x1xi32> to vector<8x10xi32>
    %14 = arith.cmpi eq, %12, %13 : vector<8x10xi32>
    %cst_4 = arith.constant 0.000000e+00 : f32
    %15 = vector.broadcast %cst_4 : f32 to vector<8x10xf32>
    %16 = arith.select %14, %0, %15 : vector<8x10xi1>, vector<8x10xf32>
    %cst_5 = arith.constant dense<0.000000e+00> : vector<8xf32>
    %17 = vector.multi_reduction <add>, %16, %cst_5 [1] : vector<8x10xf32> to vector<8xf32>
    %18 = vector.shape_cast %17 : vector<8xf32> to vector<8x1xf32>
    %19 = vector.extract_strided_slice %0 {offsets = [0, 9], sizes = [8, 1], strides = [1, 1]} : vector<8x10xf32> to vector<8x1xf32>
    %c0_6 = arith.constant 0 : index
    %20 = memref.load %arg2[%c0_6] : memref<1xf32, #tpu.memory_space<smem>>
    %cst_7 = arith.constant 1.000000e+00 : f32
    %21 = arith.addf %cst_7, %20 : f32
    %22 = vector.broadcast %21 : f32 to vector<8x1xf32>
    %23 = arith.mulf %22, %9 : vector<8x1xf32>
    %24 = arith.subf %23, %18 : vector<8x1xf32>
    %25 = vector.broadcast %20 : f32 to vector<8x1xf32>
    %26 = arith.mulf %25, %19 : vector<8x1xf32>
    %27 = arith.subf %24, %26 : vector<8x1xf32>
    %c1_i32 = arith.constant 1 : i32
    %28 = arith.muli %arg0, %c1_i32 : i32
    %29 = arith.addi %28, %arg1 : i32
    %30 = tpu.iota {dimensions = array<i32: 0>} : vector<8x1xi32>
    %c8_i32 = arith.constant 8 : i32
    %31 = arith.muli %29, %c8_i32 : i32
    %32 = vector.broadcast %31 : i32 to vector<8x1xi32>
    %33 = arith.addi %32, %30 : vector<8x1xi32>
    %c8_i32_8 = arith.constant 8 : i32
    %34 = vector.broadcast %c8_i32_8 : i32 to vector<8x1xi32>
    %35 = arith.cmpi slt, %33, %34 : vector<8x1xi32>
    %cst_9 = arith.constant 0.000000e+00 : f32
    %36 = vector.broadcast %cst_9 : f32 to vector<8x1xf32>
    %37 = arith.select %35, %27, %36 : vector<8x1xi1>, vector<8x1xf32>
    %38 = vector.shape_cast %37 : vector<8x1xf32> to vector<1x8x1xf32>
    %cst_10 = arith.constant dense<0.000000e+00> : vector<1xf32>
    %39 = vector.multi_reduction <add>, %38, %cst_10 [1, 2] : vector<1x8x1xf32> to vector<1xf32>
    %40 = vector.shape_cast %39 : vector<1xf32> to vector<1x1x1xf32>
    %41 = vector.extract %40[0, 0, 0] : f32 from vector<1x1x1xf32>
    %c0_i32 = arith.constant 0 : i32
    %42 = arith.cmpi eq, %arg1, %c0_i32 : i32
    %43 = arith.extui %42 : i1 to i32
    %c0_i32_11 = arith.constant 0 : i32
    %44 = arith.cmpi ne, %43, %c0_i32_11 : i32
    scf.if %44 {
      %cst_19 = arith.constant 0.000000e+00 : f32
      %c0_20 = arith.constant 0 : index
      %56 = memref.load %arg7[%c0_20] : memref<1xf32, #tpu.memory_space<smem>>
      memref.store %cst_19, %arg7[%c0_20] : memref<1xf32, #tpu.memory_space<smem>>
      %c0_i32_21 = arith.constant 0 : i32
      %c0_22 = arith.constant 0 : index
      %57 = memref.load %arg8[%c0_22] : memref<1xi32, #tpu.memory_space<smem>>
      memref.store %c0_i32_21, %arg8[%c0_22] : memref<1xi32, #tpu.memory_space<smem>>
    } else {
    }
    %c0_12 = arith.constant 0 : index
    %45 = memref.load %arg7[%c0_12] : memref<1xf32, #tpu.memory_space<smem>>
    %46 = arith.addf %45, %41 : f32
    %c0_13 = arith.constant 0 : index
    %47 = memref.load %arg7[%c0_13] : memref<1xf32, #tpu.memory_space<smem>>
    memref.store %46, %arg7[%c0_13] : memref<1xf32, #tpu.memory_space<smem>>
    %c0_i32_14 = arith.constant 0 : i32
    %48 = arith.cmpi eq, %arg0, %c0_i32_14 : i32
    %c0_i32_15 = arith.constant 0 : i32
    %49 = arith.cmpi eq, %arg1, %c0_i32_15 : i32
    %50 = arith.andi %48, %49 : i1
    %51 = arith.extui %50 : i1 to i32
    %c0_i32_16 = arith.constant 0 : i32
    %52 = arith.cmpi ne, %51, %c0_i32_16 : i32
    scf.if %52 {
      %c7 = arith.constant 7 : index
      %c0_19 = arith.constant 0 : index
      %56 = vector.load %arg4[%c7, %c0_19] : memref<8x10xf32, #tpu.memory_space<vmem>>, vector<1x10xf32>
      %57 = vector.extract_strided_slice %56 {offsets = [0, 9], sizes = [1, 1], strides = [1, 1]} : vector<1x10xf32> to vector<1x1xf32>
      %58 = vector.shape_cast %57 : vector<1x1xf32> to vector<1x1x1xf32>
      %cst_20 = arith.constant dense<0.000000e+00> : vector<1xf32>
      %59 = vector.multi_reduction <add>, %58, %cst_20 [1, 2] : vector<1x1x1xf32> to vector<1xf32>
      %60 = vector.shape_cast %59 : vector<1xf32> to vector<1x1x1xf32>
      %61 = vector.extract %60[0, 0, 0] : f32 from vector<1x1x1xf32>
      %62 = tpu.iota {dimensions = array<i32: 1>} : vector<1x10xi32>
      %c9_i32 = arith.constant 9 : i32
      %63 = vector.broadcast %c9_i32 : i32 to vector<1x10xi32>
      %64 = arith.cmpi eq, %62, %63 : vector<1x10xi32>
      %cst_21 = arith.constant 0xFF800000 : f32
      %65 = vector.broadcast %cst_21 : f32 to vector<1x10xf32>
      %66 = arith.select %64, %65, %56 : vector<1x10xi1>, vector<1x10xf32>
      %67 = vector.shape_cast %66 : vector<1x10xf32> to vector<1x1x10xf32>
      %cst_22 = arith.constant dense<0xFF800000> : vector<1xf32>
      %68 = vector.multi_reduction <maximumf>, %67, %cst_22 [1, 2] : vector<1x1x10xf32> to vector<1xf32>
      %69 = vector.shape_cast %68 : vector<1xf32> to vector<1x1x1xf32>
      %70 = vector.extract %69[0, 0, 0] : f32 from vector<1x1x1xf32>
      %71 = arith.cmpf ogt, %61, %70 : f32
      %72 = arith.extui %71 : i1 to i32
      %c0_23 = arith.constant 0 : index
      %73 = memref.load %arg8[%c0_23] : memref<1xi32, #tpu.memory_space<smem>>
      memref.store %72, %arg8[%c0_23] : memref<1xi32, #tpu.memory_space<smem>>
    } else {
    }
    %c0_i32_17 = arith.constant 0 : i32
    %53 = arith.cmpi eq, %arg1, %c0_i32_17 : i32
    %54 = arith.extui %53 : i1 to i32
    %c0_i32_18 = arith.constant 0 : i32
    %55 = arith.cmpi ne, %54, %c0_i32_18 : i32
    scf.if %55 {
      %c0_19 = arith.constant 0 : index
      %56 = memref.load %arg7[%c0_19] : memref<1xf32, #tpu.memory_space<smem>>
      %57 = vector.broadcast %56 : f32 to vector<8x128xf32>
      %c0_20 = arith.constant 0 : index
      %c0_21 = arith.constant 0 : index
      %58 = vector.load %arg5[%c0_20, %c0_21] : memref<8x128xf32, #tpu.memory_space<vmem>>, vector<8x128xf32>
      tpu.vector_store %arg5[%c0_20, %c0_21], %57 {strides = array<i32>} : memref<8x128xf32, #tpu.memory_space<vmem>>, vector<8x128xf32>,
      %c0_22 = arith.constant 0 : index
      %59 = memref.load %arg8[%c0_22] : memref<1xi32, #tpu.memory_space<smem>>
      %60 = vector.broadcast %59 : i32 to vector<8x128xi32>
      %c0_23 = arith.constant 0 : index
      %c0_24 = arith.constant 0 : index
      %61 = vector.load %arg6[%c0_23, %c0_24] : memref<8x128xi32, #tpu.memory_space<vmem>>, vector<8x128xi32>
      tpu.vector_store %arg6[%c0_23, %c0_24], %60 {strides = array<i32>} : memref<8x128xi32, #tpu.memory_space<vmem>>, vector<8x128xi32>,
    } else {
    }
    return
  }
  func.func @transform_0(%arg0: i32, %arg1: i32) -> i32 {
    %c0_i32 = arith.constant 0 : i32
    %c0_i32_0 = arith.constant 0 : i32
    return %c0_i32 : i32
  }
  func.func @transform_1(%arg0: i32, %arg1: i32) -> (i32, i32) {
    %c1_i32 = arith.constant 1 : i32
    %0 = arith.muli %arg0, %c1_i32 : i32
    %1 = arith.addi %0, %arg1 : i32
    %c0_i32 = arith.constant 0 : i32
    %2 = arith.minsi %1, %c0_i32 : i32
    %c0_i32_0 = arith.constant 0 : i32
    %c0_i32_1 = arith.constant 0 : i32
    return %2, %c0_i32_0 : i32, i32
  }
  func.func @transform_2(%arg0: i32, %arg1: i32) -> (i32, i32) {
    %c1_i32 = arith.constant 1 : i32
    %0 = arith.muli %arg0, %c1_i32 : i32
    %1 = arith.addi %0, %arg1 : i32
    %c0_i32 = arith.constant 0 : i32
    %2 = arith.minsi %1, %c0_i32 : i32
    %c0_i32_0 = arith.constant 0 : i32
    %c0_i32_1 = arith.constant 0 : i32
    return %2, %c0_i32_0 : i32, i32
  }
  func.func @transform_3(%arg0: i32, %arg1: i32) -> (i32, i32) {
    %c0_i32 = arith.constant 0 : i32
    %c0_i32_0 = arith.constant 0 : i32
    return %arg0, %c0_i32 : i32, i32
  }
  func.func @transform_4(%arg0: i32, %arg1: i32) -> (i32, i32) {
    %c0_i32 = arith.constant 0 : i32
    %c0_i32_0 = arith.constant 0 : i32
    return %arg0, %c0_i32 : i32, i32
  }
}

</mosaic_0001>

<bundles_post_ra>
// kernel: _ctr_loss_step.1
= control target key start
LH: loop header
LB: loop body
LE: loop exit
PB: predicated region body
PF: predicated region fallthrough
CT: control target
= control target key end

     0   :  { %vm72_vm0 = vcmask 80896   ;;  %v211_v1 = vmov 0   ;;  %v87_v8 = vlaneseq  ;;  %vm154_vm3 = vcmask 73728   ;;  %s262_s2 = inlined_call_operand.vmem [shape: f32[8,10], index: 2, kind: input, shape index: {}]   ;;  %s263_s1 = inlined_call_operand.vmem [shape: s8[8,1], index: 1, kind: input, shape index: {}]   ;;  %s264_s0 = inlined_call_operand.<no memory space> [shape: f32[1], index: 0, kind: input, shape index: {}]   ;;  %s265_s3 = inlined_call_operand.vmem [shape: f32[8,128], index: 3, kind: output, shape index: {0}]   ;;  %s266_s4 = inlined_call_operand.vmem [shape: s32[8,128], index: 4, kind: output, shape index: {1}]  }
   0x1   :  { %v71_v0 = vld [vmem:[%s262_s2] sm:$0xff]  ;;  %206 = vset.pattern.permute.xlu0 %v211_v1  ;;  %s98_s22 = sadd.f32 1.0, %s264_s0  ;;  %v102_v22 = vstv %s264_s0  ;;  %vm117_vm4 = vcmask 7168  }
   0x2   :  { %v73_v2 = vsel %vm72_vm0, %v71_v0, -inf  ;;  %v85_v3 = vld [vmem:[%s263_s1] sm:$0x3]  ;;  %v88_v9 = vand.u32 127, %v87_v8  ;;  %v145_v15 = vld [vmem:[%s262_s2 + $0x7] sm:$0x1]  ;;  %v103_v26 = vmul.f32 %v102_v22, %v71_v0 }
   0x3   :  { %74 = vmax.xlane.f32.xlu0 %v73_v2  ;;  %v86_v4 = vunpack.c.0.s8 %v85_v3  ;;  %v99_v21 = vstv %s98_s22  ;;  %s212_s2 = smov 119  }
   0x4   :  { %vm152_vm2 = vcmp.eq.s32.totalorder %v88_v9, 9 }
   0x5   :  { %v153_v16 = vsel %vm152_vm2, -inf, %v145_v15 }
   0x6   :  { %v155_v17 = vsel %vm154_vm3, %v153_v16, -inf }
  0x19   :  { %90 = vperm.xlu0 %206, %v86_v4  }
  0x38   :  { %156 = vmax.xlane.f32.xlu0 %v155_v17 }
  0x8c   :  { %v75_v5 = vpop.xlane.xlu0 %74 }
  0x8d   :  { %v76_v6 = vsub.f32 %v71_v0, %v75_v5 }
  0x8f   :  { %v77_v7 = vmul.f32 1.442695, %v76_v6 }
  0x91   :  { %207 = vpow2.f32 %v77_v7 }
  0x94   :  { %v91_v10 = vpop.permute.xlu0 %90 }
  0x95   :  { %vm92_vm1 = vcmp.eq.s32.totalorder %v88_v9, %v91_v10 }
  0x96   :  { %v93_v12 = vsel %vm92_vm1, %v71_v0, 0.0 }
  0x97   :  { %v94_v14 = vsel %vm72_vm0, %v93_v12, 0.0 }
  0x9e   :  { %v208_v11 = vpop.eup %207 }
  0x9f   :  { %v79_v13 = vsel %vm72_vm0, %v208_v11, 0.0 }
  0xa0   :  { %80 = vadd.xlane.f32.xlu1 %v79_v13 }
  0xa4   :  { %95 = vadd.xlane.f32.xlu1 %v94_v14 }
  0xc1   :  { %v157_v31 = vpop.xlane.xlu0 %156 }
  0xc2   :  { %v158_v32 = vrot.slane %v157_v31, 4 }
  0xc4   :  { %v159_v33 = vmax.f32 %v157_v31, %v158_v32 }
  0xc6   :  { %v160_v35 = vrot.slane %v159_v33, 2 }
  0xc8   :  { %v161_v38 = vmax.f32 %v159_v33, %v160_v35 }
  0xca   :  { %v162_v42 = vrot.slane %v161_v38, 1 }
  0xcc   :  { %v163_v45 = vmax.f32 %v161_v38, %v162_v42 }
 0x129   :  { %v81_v18 = vpop.xlane.xlu1 %80 }
 0x12a   :  { %209 = vlog2.f32 %v81_v18 }
 0x12d   :  { %v96_v24 = vpop.xlane.xlu1 %95 }
 0x137   :  { %v210_v19 = vpop.eup %209 }
 0x138   :  { %v83_v20 = vmul.f32 0.6931472, %v210_v19 }
 0x13a   :  { %v84_v23 = vadd.f32 %v83_v20, %v75_v5 }
 0x13c   :  { %v100_v25 = vmul.f32 %v99_v21, %v84_v23 }
 0x13e   :  { %v101_v27 = vsub.f32 %v100_v25, %v96_v24 }
 0x140   :  { %v104_v28 = vsub.f32 %v101_v27, %v103_v26 }
 0x142   :  { %114 = vrot.lane.b32.xlu1 %v104_v28, %s212_s2 }
 0x1b4   :  { %v115_v29 = vpop.permute.xlu1 %114 }
 0x1b5   :  { %v118_v30 = vsel %vm117_vm4, %v115_v29, 0.0 }
 0x1b6   :  { %119 = vadd.xlane.f32.xlu1 %v118_v30 }
 0x1c7   :  { %148 = vrot.lane.b32.xlu1 %v145_v15, %s212_s2 }
 0x23f   :  { %v120_v34 = vpop.xlane.xlu1 %119 }
 0x240   :  { %v121_v36 = vrot.slane %v120_v34, 4 }
 0x242   :  { %v122_v37 = vadd.f32 %v121_v36, %v120_v34 }
 0x243   :  { %v149_v43 = vpop.permute.xlu1 %148 }
 0x244   :  { %v123_v39 = vrot.slane %v122_v37, 2 }
 0x246   :  { %v124_v40 = vadd.f32 %v123_v39, %v122_v37 }
 0x248   :  { %v125_v41 = vrot.slane %v124_v40, 1 }
 0x24a   :  { %v126_v44 = vadd.f32 %v125_v41, %v124_v40 }
 0x24c   :  { %198 = vpush %v126_v44 }
 0x24d   :  { %200 = vpush %v149_v43 }
 0x24e   :  { %202 = vpush %v163_v45 }
 0x27d   :  { %s199_s0 = spop %198 }
 0x27e   :  { %v173_v46 = vstv %s199_s0  ;;  %s201_s25 = spop %200 }
 0x27f   :  { %174 = vst [vmem:[%s265_s3] sm:$0xff] %v173_v46  ;;  %s203_s28 = spop %202 }
 0x280   :  { %p165_p0 = scmp.gt.f32.partialorder %s201_s25, %s203_s28 }
 0x282   :  { %s166_s29 = scalar_select %p165_p0, 1, 0 }
 0x284   :  { %v176_v47 = vstv %s166_s29 }
 0x285   :  { %177 = vst [vmem:[%s266_s4] sm:$0xff] %v176_v47 }

</bundles_post_ra>
